<compile_context>
chip_gen: v6e
topology: v6e:2x2x1
jax: 0.10.0
libtpu: 0.0.40
codegen_flags: <defaults>
</compile_context>

<pallas_src>
import jax
import jax.numpy as jnp
from jax.experimental import pallas as pl
from jax.experimental.pallas import tpu as pltpu

IN_DIM = 784
HID_DIM = 128
OUT_DIM = 10
OUT_PAD = 128          # lane-dense fc2 / output width
_NEG_BIG = -1e30       # bias for padded classes -> zero probability after softmax


def _bnn_kernel(x_ref, w1_ref, b1_ref, w2_ref, b2_ref, o_ref):
    # fc1: bf16 MXU matmul, f32 accumulate; epilogue stays f32 (v5e-friendly).
    h = jnp.dot(x_ref[...], w1_ref[...], preferred_element_type=jnp.float32)
    h = h + b1_ref[...]
    # sigmoid via EUP exp + approx reciprocal (keeps VALU slots free).
    h = pl.reciprocal(1.0 + jnp.exp(-h), approx=True)

    # fc2: bf16 MXU matmul into a lane-dense 128-wide output (cols 10..127 are padding).
    logits = jnp.dot(h.astype(jnp.bfloat16), w2_ref[...],
                     preferred_element_type=jnp.float32) + b2_ref[...]

    # Numerically stable softmax over all 128 lanes; padded lanes carry a -1e30
    # bias so exp(...) == 0 and they contribute nothing to the denominator.
    m = jnp.max(logits, axis=-1, keepdims=True)
    e = jnp.exp(logits - m)
    denom = jnp.sum(e, axis=-1, keepdims=True)
    o_ref[...] = (e * pl.reciprocal(denom, approx=True)).astype(o_ref.dtype)


def _round_up(n, m):
    return ((n + m - 1) // m) * m


@jax.jit
def bnn_forward(x, w1, b1, w2, b2):
    """x: any shape with prod(trailing dims) == 784 (e.g. (B, 1, 28, 28)). Returns (B, 10)."""
    x2 = x.reshape(-1, IN_DIM)                     # x.view(-1, 784)
    batch = x2.shape[0]

    # Batch tile: large enough to hide DMA latency / feed the MXU, small enough for VMEM.
    # Multiple of 16 for bf16 sublane packing.
    tb = 512 if batch >= 512 else _round_up(max(batch, 1), 16)
    bp = _round_up(batch, tb)
    if bp != batch:
        x2 = jnp.pad(x2, ((0, bp - batch), (0, 0)))

    # MXU operands in bf16; biases stay f32 for the f32 epilogue.
    x_bf = x2.astype(jnp.bfloat16)
    w1_bf = w1.astype(jnp.bfloat16)
    b1_f = b1.astype(jnp.float32)
    # Lane-dense fc2: zero-pad weight columns, -1e30 bias on the padded classes.
    w2_p = jnp.pad(w2.astype(jnp.bfloat16), ((0, 0), (0, OUT_PAD - OUT_DIM)))
    b2_p = jnp.pad(b2.astype(jnp.float32), ((0, 0), (0, OUT_PAD - OUT_DIM)),
                   constant_values=_NEG_BIG)

    grid = (bp // tb,)
    flops = 2 * bp * (IN_DIM * HID_DIM + HID_DIM * OUT_PAD)
    transcendentals = bp * (HID_DIM + OUT_PAD)
    bytes_accessed = (bp * IN_DIM * 2 + bp * OUT_PAD * 4
                      + IN_DIM * HID_DIM * 2 + HID_DIM * OUT_PAD * 2
                      + HID_DIM * 4 + OUT_PAD * 4)

    out = pl.pallas_call(
        _bnn_kernel,
        out_shape=jax.ShapeDtypeStruct((bp, OUT_PAD), jnp.float32),
        grid=grid,
        in_specs=[
            pl.BlockSpec((tb, IN_DIM), lambda i: (i, 0)),         # x: tiled over batch
            pl.BlockSpec((IN_DIM, HID_DIM), lambda i: (0, 0)),    # w1: VMEM-resident
            pl.BlockSpec((1, HID_DIM), lambda i: (0, 0)),         # b1
            pl.BlockSpec((HID_DIM, OUT_PAD), lambda i: (0, 0)),   # w2 (lane-padded)
            pl.BlockSpec((1, OUT_PAD), lambda i: (0, 0)),         # b2 (lane-padded)
        ],
        out_specs=pl.BlockSpec((tb, OUT_PAD), lambda i: (i, 0)),
        compiler_params=pltpu.CompilerParams(
            dimension_semantics=("parallel",)),
        cost_estimate=pl.CostEstimate(
            flops=flops,
            transcendentals=transcendentals,
            bytes_accessed=bytes_accessed),
    )(x_bf, w1_bf, b1_f, w2_p, b2_p)

    return out[:batch, :OUT_DIM]


def init_params(key):
    """Deterministic init mimicking nn.Linear's U(-1/sqrt(fan_in), 1/sqrt(fan_in))."""
    k1, k2, k3, k4 = jax.random.split(key, 4)
    s1 = 1.0 / jnp.sqrt(jnp.float32(IN_DIM))
    s2 = 1.0 / jnp.sqrt(jnp.float32(HID_DIM))
    w1 = jax.random.uniform(k1, (IN_DIM, HID_DIM), jnp.float32, -s1, s1)
    b1 = jax.random.uniform(k2, (1, HID_DIM), jnp.float32, -s1, s1)
    w2 = jax.random.uniform(k3, (HID_DIM, OUT_DIM), jnp.float32, -s2, s2)
    b2 = jax.random.uniform(k4, (1, OUT_DIM), jnp.float32, -s2, s2)
    return w1, b1, w2, b2


if __name__ == "__main__":
    key = jax.random.PRNGKey(0)
    kx, kp = jax.random.split(key)

    # Small MNIST-like input: (batch=2, 1, 28, 28); forward views it as (-1, 784).
    x = jax.random.normal(kx, (2, 1, 28, 28), jnp.float32)
    w1, b1, w2, b2 = init_params(kp)

    out = bnn_forward(x, w1, b1, w2, b2)
    out = jax.block_until_ready(out)

    # Sanity checks vs. a pure-JAX f32 reference (bf16 matmul + approx reciprocal
    # introduce small, bounded differences).
    x2 = x.reshape(-1, IN_DIM)
    ref = jax.nn.softmax(jax.nn.sigmoid(x2 @ w1 + b1) @ w2 + b2, axis=1)
    assert out.shape == (2, OUT_DIM)
    assert jnp.allclose(jnp.sum(out, axis=1), 1.0, atol=5e-3)
    assert jnp.allclose(out, ref, atol=3e-2)

    print("KERNEL_OK")
</pallas_src>

<mosaic_0001>
module attributes {stable_mosaic.version = 11 : i64} {
  func.func @_bnn_kernel(%arg0: i32, %arg1: memref<16x784xbf16, #tpu.memory_space<vmem>>, %arg2: memref<784x128xbf16, #tpu.memory_space<vmem>>, %arg3: memref<1x128xf32, #tpu.memory_space<vmem>>, %arg4: memref<128x128xbf16, #tpu.memory_space<vmem>>, %arg5: memref<1x128xf32, #tpu.memory_space<vmem>>, %arg6: memref<16x128xf32, #tpu.memory_space<vmem>>) attributes {dimension_semantics = [#tpu.dimension_semantics<parallel>], iteration_bounds = array<i64: 1>, scalar_prefetch = 0 : i64, scratch_operands = 0 : i64, tpu.core_type = #tpu.core_type<tc>, window_params = [{transform_indices = @transform_0, window_bounds = array<i64: 16, 784>}, {pipeline_mode = #tpu.pipeline_mode<synchronous>, transform_indices = @transform_1, window_bounds = array<i64: 784, 128>}, {pipeline_mode = #tpu.pipeline_mode<synchronous>, transform_indices = @transform_2, window_bounds = array<i64: 1, 128>}, {pipeline_mode = #tpu.pipeline_mode<synchronous>, transform_indices = @transform_3, window_bounds = array<i64: 128, 128>}, {pipeline_mode = #tpu.pipeline_mode<synchronous>, transform_indices = @transform_4, window_bounds = array<i64: 1, 128>}, {transform_indices = @transform_5, window_bounds = array<i64: 16, 128>}]} {
    %c0 = arith.constant 0 : index
    %c0_0 = arith.constant 0 : index
    %0 = vector.load %arg1[%c0, %c0_0] : memref<16x784xbf16, #tpu.memory_space<vmem>>, vector<16x784xbf16>
    %c0_1 = arith.constant 0 : index
    %c0_2 = arith.constant 0 : index
    %1 = vector.load %arg2[%c0_1, %c0_2] : memref<784x128xbf16, #tpu.memory_space<vmem>>, vector<784x128xbf16>
    %cst = arith.constant dense<0.000000e+00> : vector<16x128xf32>
    %2 = tpu.matmul %0, %1, %cst {dimension_numbers = #tpu.dot_dimension_numbers<[1], [0], [0], [1], [0, 0, 1, 1], [], []>} : vector<16x784xbf16>, vector<784x128xbf16>, vector<16x128xf32> -> vector<16x128xf32>
    %c0_3 = arith.constant 0 : index
    %c0_4 = arith.constant 0 : index
    %3 = vector.load %arg3[%c0_3, %c0_4] : memref<1x128xf32, #tpu.memory_space<vmem>>, vector<1x128xf32>
    %4 = vector.broadcast %3 : vector<1x128xf32> to vector<16x128xf32>
    %5 = arith.addf %2, %4 : vector<16x128xf32>
    %cst_5 = arith.constant 0.000000e+00 : f32
    %6 = vector.broadcast %cst_5 : f32 to vector<16x128xf32>
    %7 = arith.subf %6, %5 : vector<16x128xf32>
    %8 = math.exp %7 : vector<16x128xf32>
    %cst_6 = arith.constant 1.000000e+00 : f32
    %9 = vector.broadcast %cst_6 : f32 to vector<16x128xf32>
    %10 = arith.addf %9, %8 : vector<16x128xf32>
    %11 = tpu.reciprocal %10 {approx = true} : vector<16x128xf32> -> vector<16x128xf32>
    %12 = arith.truncf %11 : vector<16x128xf32> to vector<16x128xbf16>
    %c0_7 = arith.constant 0 : index
    %c0_8 = arith.constant 0 : index
    %13 = vector.load %arg4[%c0_7, %c0_8] : memref<128x128xbf16, #tpu.memory_space<vmem>>, vector<128x128xbf16>
    %cst_9 = arith.constant dense<0.000000e+00> : vector<16x128xf32>
    %14 = tpu.matmul %12, %13, %cst_9 {dimension_numbers = #tpu.dot_dimension_numbers<[1], [0], [0], [1], [0, 0, 1, 1], [], []>} : vector<16x128xbf16>, vector<128x128xbf16>, vector<16x128xf32> -> vector<16x128xf32>
    %c0_10 = arith.constant 0 : index
    %c0_11 = arith.constant 0 : index
    %15 = vector.load %arg5[%c0_10, %c0_11] : memref<1x128xf32, #tpu.memory_space<vmem>>, vector<1x128xf32>
    %16 = vector.broadcast %15 : vector<1x128xf32> to vector<16x128xf32>
    %17 = arith.addf %14, %16 : vector<16x128xf32>
    %cst_12 = arith.constant dense<0xFF800000> : vector<16xf32>
    %18 = vector.multi_reduction <maximumf>, %17, %cst_12 [1] : vector<16x128xf32> to vector<16xf32>
    %19 = vector.shape_cast %18 : vector<16xf32> to vector<16x1xf32>
    %20 = vector.broadcast %19 : vector<16x1xf32> to vector<16x128xf32>
    %21 = arith.subf %17, %20 : vector<16x128xf32>
    %22 = math.exp %21 : vector<16x128xf32>
    %cst_13 = arith.constant dense<0.000000e+00> : vector<16xf32>
    %23 = vector.multi_reduction <add>, %22, %cst_13 [1] : vector<16x128xf32> to vector<16xf32>
    %24 = vector.shape_cast %23 : vector<16xf32> to vector<16x1xf32>
    %25 = tpu.reciprocal %24 {approx = true} : vector<16x1xf32> -> vector<16x1xf32>
    %26 = vector.broadcast %25 : vector<16x1xf32> to vector<16x128xf32>
    %27 = arith.mulf %22, %26 : vector<16x128xf32>
    %c0_14 = arith.constant 0 : index
    %c0_15 = arith.constant 0 : index
    %28 = vector.load %arg6[%c0_14, %c0_15] : memref<16x128xf32, #tpu.memory_space<vmem>>, vector<16x128xf32>
    tpu.vector_store %arg6[%c0_14, %c0_15], %27 {strides = array<i32>} : memref<16x128xf32, #tpu.memory_space<vmem>>, vector<16x128xf32>,
    return
  }
  func.func @transform_0(%arg0: i32) -> (i32, i32) {
    %c0_i32 = arith.constant 0 : i32
    %c0_i32_0 = arith.constant 0 : i32
    return %arg0, %c0_i32 : i32, i32
  }
  func.func @transform_1(%arg0: i32) -> (i32, i32) {
    %c0_i32 = arith.constant 0 : i32
    %c0_i32_0 = arith.constant 0 : i32
    %c0_i32_1 = arith.constant 0 : i32
    return %c0_i32, %c0_i32_0 : i32, i32
  }
  func.func @transform_2(%arg0: i32) -> (i32, i32) {
    %c0_i32 = arith.constant 0 : i32
    %c0_i32_0 = arith.constant 0 : i32
    %c0_i32_1 = arith.constant 0 : i32
    return %c0_i32, %c0_i32_0 : i32, i32
  }
  func.func @transform_3(%arg0: i32) -> (i32, i32) {
    %c0_i32 = arith.constant 0 : i32
    %c0_i32_0 = arith.constant 0 : i32
    %c0_i32_1 = arith.constant 0 : i32
    return %c0_i32, %c0_i32_0 : i32, i32
  }
  func.func @transform_4(%arg0: i32) -> (i32, i32) {
    %c0_i32 = arith.constant 0 : i32
    %c0_i32_0 = arith.constant 0 : i32
    %c0_i32_1 = arith.constant 0 : i32
    return %c0_i32, %c0_i32_0 : i32, i32
  }
  func.func @transform_5(%arg0: i32) -> (i32, i32) {
    %c0_i32 = arith.constant 0 : i32
    %c0_i32_0 = arith.constant 0 : i32
    return %arg0, %c0_i32 : i32, i32
  }
}

</mosaic_0001>

<bundles_post_ra>
// kernel: bnn_forward.1
= control target key start
LH: loop header
LB: loop body
LE: loop exit
PB: predicated region body
PF: predicated region fallthrough
CT: control target
= control target key end

     0   :  { %v1033_v38 = vmov 0.0   ;;  %vm1034_vm0 = vmmov 0   ;;  %vm463_vm1 = vcmask 130048   ;;  %s1282_s1 = inlined_call_operand.vmem [shape: bf16[784,128], index: 1, kind: input, shape index: {}]   ;;  %s1283_s0 = inlined_call_operand.vmem [shape: bf16[16,784], index: 0, kind: input, shape index: {}]   ;;  %s1284_s3 = inlined_call_operand.vmem [shape: bf16[128,128], index: 3, kind: input, shape index: {}]   ;;  %s1285_s2 = inlined_call_operand.vmem [shape: f32[1,128], index: 2, kind: input, shape index: {}]   ;;  %s1286_s4 = inlined_call_operand.vmem [shape: f32[1,128], index: 4, kind: input, shape index: {}]   ;;  %s1287_s5 = inlined_call_operand.vmem [shape: f32[16,128], index: 5, kind: output, shape index: {}]  }
   0x1   :  { %v950_v0 = vld [vmem:[%s1282_s1 + $0x78] sm:$0xff]   ;;  %v954_v4 = vld [vmem:[%s1282_s1 + $0x70] sm:$0xff]   ;;  %v958_v8 = vld [vmem:[%s1282_s1 + $0x68] sm:$0xff]  }
   0x2   :  { %v951_v1 = vld [vmem:[%s1282_s1 + $0x38] sm:$0xff]   ;;  %845 = vmatprep.subr.bf16.mxu0 %v950_v0  ;;  %v955_v5 = vld [vmem:[%s1282_s1 + $0x30] sm:$0xff]   ;;  %v959_v9 = vld [vmem:[%s1282_s1 + $0x28] sm:$0xff]  }
   0x3   :  { %v952_v2 = vld [vmem:[%s1282_s1 + $0xf8] sm:$0xff]   ;;  %846 = vmatpush3.bf16.msra.mxu0 %v951_v1  ;;  %v956_v6 = vld [vmem:[%s1282_s1 + $0xf0] sm:$0xff]   ;;  %v960_v10 = vld [vmem:[%s1282_s1 + $0xe8] sm:$0xff]  }
   0x4   :  { %v953_v3 = vld [vmem:[%s1282_s1 + $0xb8] sm:$0xff]   ;;  %867 = vmatprep.subr.bf16.mxu1 %v952_v2  ;;  %847 = vmatprep.subr.bf16.mxu0 %v954_v4  ;;  %v957_v7 = vld [vmem:[%s1282_s1 + $0xb0] sm:$0xff]   ;;  %v961_v11 = vld [vmem:[%s1282_s1 + $0xa8] sm:$0xff]  }
   0x5   :  { %868 = vmatpush3.bf16.msra.mxu1 %v953_v3  ;;  %v962_v12 = vld [vmem:[%s1282_s1 + $0x60] sm:$0xff]   ;;  %v966_v16 = vld [vmem:[%s1282_s1 + $0x58] sm:$0xff]   ;;  %v970_v20 = vld [vmem:[%s1282_s1 + $0x50] sm:$0xff]  }
   0x6   :  { %869 = vmatprep.subr.bf16.mxu1 %v956_v6  ;;  %v963_v13 = vld [vmem:[%s1282_s1 + $0x20] sm:$0xff]   ;;  %v967_v17 = vld [vmem:[%s1282_s1 + $0x18] sm:$0xff]   ;;  %v971_v21 = vld [vmem:[%s1282_s1 + $0x10] sm:$0xff]  }
   0x7   :  { %848 = vmatpush3.bf16.msra.mxu0 %v955_v5  ;;  %v964_v14 = vld [vmem:[%s1282_s1 + $0xe0] sm:$0xff]   ;;  %v968_v18 = vld [vmem:[%s1282_s1 + $0xd8] sm:$0xff]   ;;  %v972_v22 = vld [vmem:[%s1282_s1 + $0xd0] sm:$0xff]  }
   0x8   :  { %849 = vmatprep.subr.bf16.mxu0 %v958_v8  ;;  %v965_v15 = vld [vmem:[%s1282_s1 + $0xa0] sm:$0xff]   ;;  %v969_v19 = vld [vmem:[%s1282_s1 + $0x98] sm:$0xff]   ;;  %v973_v23 = vld [vmem:[%s1282_s1 + $0x90] sm:$0xff]  }
   0x9   :  { %870 = vmatpush3.bf16.msra.mxu1 %v957_v7  ;;  %v974_v24 = vld [vmem:[%s1282_s1 + $0x48] sm:$0xff]   ;;  %v978_v28 = vld [vmem:[%s1282_s1 + $0x40] sm:$0xff]   ;;  %v985_v34 = vld [vmem:[%s1282_s1 + $0x178] sm:$0xff]  }
   0xa   :  { %871 = vmatprep.subr.bf16.mxu1 %v960_v10  ;;  %v975_v25 = vld [vmem:[%s1282_s1 + $0x8] sm:$0xff]   ;;  %v979_v29 = vld [vmem:[%s1282_s1] sm:$0xff]   ;;  %v989_v37 = vld [vmem:[%s1282_s1 + $0x138] sm:$0xff]  }
   0xb   :  { %850 = vmatpush3.bf16.msra.mxu0 %v959_v9  ;;  %v976_v26 = vld [vmem:[%s1282_s1 + $0xc8] sm:$0xff]   ;;  %v980_v30 = vld [vmem:[%s1282_s1 + $0xc0] sm:$0xff]   ;;  %v990_v39 = vld [vmem:[%s1282_s1 + $0x170] sm:$0xff]  }
   0xc   :  { %851 = vmatprep.subr.bf16.mxu0 %v962_v12  ;;  %v977_v27 = vld [vmem:[%s1282_s1 + $0x88] sm:$0xff]   ;;  %v981_v31 = vld [vmem:[%s1283_s0] ss:$28 sps:$4 sm:$0xff]   ;;  %v991_v40 = vld [vmem:[%s1282_s1 + $0x130] sm:$0xff]  }
   0xd   :  { %872 = vmatpush3.bf16.msra.mxu1 %v961_v11  ;;  %v983_v32 = vld [vmem:[%s1283_s0 + $0x4] ss:$28 sps:$4 sm:$0xff]   ;;  %v988_v36 = vld [vmem:[%s1283_s0 + $0xc] ss:$28 sps:$4 sm:$0xff]   ;;  %v996_v45 = vld [vmem:[%s1282_s1 + $0x158] sm:$0xff]  }
   0xe   :  { %873 = vmatprep.subr.bf16.mxu1 %v964_v14  ;;  %v984_v33 = vld [vmem:[%s1282_s1 + $0x80] sm:$0xff]   ;;  %499 = vmatprep.mubr.bf16.mxu0 %v983_v32  ;;  %v992_v41 = vld [vmem:[%s1282_s1 + $0x168] sm:$0xff]   ;;  %v997_v46 = vld [vmem:[%s1282_s1 + $0x118] sm:$0xff]  }
   0xf   :  { %852 = vmatpush3.bf16.msra.mxu0 %v963_v13  ;;  %v986_v35 = vld [vmem:[%s1283_s0 + $0x8] ss:$28 sps:$4 sm:$0xff]   ;;  %540 = vmatprep.mubr.bf16.mxu1 %v988_v36  ;;  %v998_v47 = vld [vmem:[%s1282_s1 + $0x150] sm:$0xff]   ;;  %v1009_v57 = vld [vmem:[%s1284_s3 + $0x38] sm:$0xff]  }
  0x10   :  { %853 = vmatprep.subr.bf16.mxu0 %v966_v16  ;;  %v993_v42 = vld [vmem:[%s1282_s1 + $0x128] sm:$0xff]   ;;  %v994_v43 = vld [vmem:[%s1282_s1 + $0x160] sm:$0xff]   ;;  %v1007_v49 = vld [vmem:[%s1283_s0 + $0x14] ss:$28 sps:$4 sm:$0xff]  }
  0x11   :  { %874 = vmatpush3.bf16.msra.mxu1 %v965_v15  ;;  %v995_v44 = vld [vmem:[%s1282_s1 + $0x120] sm:$0xff]   ;;  %v1008_v50 = vld [vmem:[%s1283_s0 + $0x18] ss:$28 sps:$4 sm:$0xff]   ;;  %v1000_v52 = vld [vmem:[%s1282_s1 + $0x148] sm:$0xff]  }
  0x12   :  { %875 = vmatprep.subr.bf16.mxu1 %v968_v18  ;;  %v1004_v48 = vld [vmem:[%s1282_s1 + $0x180] sm:$0xff]   ;;  %v999_v51 = vld [vmem:[%s1282_s1 + $0x110] sm:$0xff]   ;;  %v1001_v53 = vld [vmem:[%s1282_s1 + $0x108] sm:$0xff]  }
  0x13   :  { %854 = vmatpush3.bf16.msra.mxu0 %v967_v17  ;;  %v1002_v54 = vld [vmem:[%s1282_s1 + $0x140] sm:$0xff]   ;;  %v1005_v56 = vld [vmem:[%s1283_s0 + $0x10] ss:$28 sps:$4 sm:$0xff]   ;;  %v1013_v61 = vld [vmem:[%s1284_s3 + $0x18] sm:$0xff]  }
  0x14   :  { %855 = vmatprep.subr.bf16.mxu0 %v970_v20  ;;  %v1003_v55 = vld [vmem:[%s1282_s1 + $0x100] sm:$0xff]   ;;  %v1010_v58 = vld [vmem:[%s1284_s3 + $0x30] sm:$0xff]   ;;  %v1011_v59 = vld [vmem:[%s1284_s3 + $0x28] sm:$0xff]  }
  0x15   :  { %876 = vmatpush3.bf16.msra.mxu1 %v969_v19  ;;  %v1012_v60 = vld [vmem:[%s1284_s3 + $0x20] sm:$0xff]   ;;  %v1014_v62 = vld [vmem:[%s1284_s3 + $0x10] sm:$0xff]   ;;  %v1015_v63 = vld [vmem:[%s1284_s3 + $0x8] sm:$0xff]  }
  0x16   :  { %877 = vmatprep.subr.bf16.mxu1 %v972_v22  ;;  %v1016_v0 = vld [vmem:[%s1284_s3] sm:$0xff]  }
  0x17   :  { %856 = vmatpush3.bf16.msra.mxu0 %v971_v21  ;;  %v778_v13 = vld [vmem:[%s1285_s2] ss:$0 sm:$0xff] }
  0x18   :  { %857 = vmatprep.subr.bf16.mxu0 %v974_v24 }
  0x19   :  { %878 = vmatpush3.bf16.msra.mxu1 %v973_v23 }
  0x1a   :  { %879 = vmatprep.subr.bf16.mxu1 %v976_v26 }
  0x1b   :  { %858 = vmatpush3.bf16.msra.mxu0 %v975_v25 }
  0x1c   :  { %859 = vmatprep.subr.bf16.mxu0 %v978_v28 }
  0x1d   :  { %880 = vmatpush3.bf16.msra.mxu1 %v977_v27 }
  0x1e   :  { %881 = vmatprep.subr.bf16.mxu1 %v980_v30 }
  0x1f   :  { %860 = vmatpush3.bf16.msra.mxu0 %v979_v29 }
  0x20   :  { %889 = vmatprep.subr.bf16.mxu0 %v985_v34 }
  0x21   :  { %882 = vmatpush3.bf16.msra.mxu1 %v984_v33 }
  0x22   :  { %500 = vmatmul.mubr.bf16.vlgmr.msra.gmra.mxu0 %v981_v31  ;;  %922 = vmatprep.subr.bf16.mxu1 %v1033_v38 }
  0x23   :  { %890 = vmatpush3.bf16.msra.mxu0 %v989_v37  ;;  %581 = vmatprep.mubr.bf16.mxu0 %v1007_v49 }
  0x24   :  { %541 = vmatmul.mubr.bf16.vlgmr.msra.gmra.mxu1 %v986_v35  ;;  %891 = vmatprep.subr.bf16.mxu0 %v990_v39 }
  0x25   :  { %924 = vmatprep.mubr.msk.bf16.mxu1 %vm1034_vm0, %v1033_v38  ;;  %923 = vmatpush3.bf16.msra.mxu1 %v1004_v48 }
  0x26   :  { %928 = vmatprep.subr.bf16.mxu1 %v1033_v38 }
  0x27   :  { %892 = vmatpush3.bf16.msra.mxu0 %v991_v40 }
  0x28   :  { %893 = vmatprep.subr.bf16.mxu0 %v992_v41 }
  0x2b   :  { %894 = vmatpush3.bf16.msra.mxu0 %v993_v42 }
  0x2c   :  { %895 = vmatprep.subr.bf16.mxu0 %v994_v43  ;;  %925 = vmatmul.mubr.msk.bf16.vlgmr.msra.gmra.mxu1 %vm463_vm1, %v1008_v50  ;;  %v836_v43 = vld [vmem:[%s1286_s4] ss:$0 sm:$0xff] }
  0x2d   :  { %944 = vmatprep.mubr.msk.bf16.mxu1 %vm1034_vm0, %v1033_v38  ;;  %929 = vmatpush3.bf16.msra.mxu1 %v1009_v57 }
  0x2e   :  { %930 = vmatprep.subr.bf16.mxu1 %v1033_v38 }
  0x2f   :  { %896 = vmatpush3.bf16.msra.mxu0 %v995_v44 }
  0x30   :  { %897 = vmatprep.subr.bf16.mxu0 %v996_v45 }
  0x31   :  { %931 = vmatpush3.bf16.msra.mxu1 %v1010_v58 }
  0x32   :  { %932 = vmatprep.subr.bf16.mxu1 %v1033_v38 }
  0x33   :  { %898 = vmatpush3.bf16.msra.mxu0 %v997_v46 }
  0x34   :  { %899 = vmatprep.subr.bf16.mxu0 %v998_v47 }
  0x35   :  { %933 = vmatpush3.bf16.msra.mxu1 %v1011_v59 }
  0x36   :  { %934 = vmatprep.subr.bf16.mxu1 %v1033_v38 }
  0x37   :  { %900 = vmatpush3.bf16.msra.mxu0 %v999_v51 }
  0x38   :  { %901 = vmatprep.subr.bf16.mxu0 %v1000_v52 }
  0x39   :  { %935 = vmatpush3.bf16.msra.mxu1 %v1012_v60 }
  0x3a   :  { %936 = vmatprep.subr.bf16.mxu1 %v1033_v38 }
  0x3b   :  { %902 = vmatpush3.bf16.msra.mxu0 %v1001_v53 }
  0x3c   :  { %903 = vmatprep.subr.bf16.mxu0 %v1002_v54 }
  0x3d   :  { %937 = vmatpush3.bf16.msra.mxu1 %v1013_v61 }
  0x3e   :  { %938 = vmatprep.subr.bf16.mxu1 %v1033_v38 }
  0x3f   :  { %904 = vmatpush3.bf16.msra.mxu0 %v1003_v55 }
  0x41   :  { %939 = vmatpush3.bf16.msra.mxu1 %v1014_v62 }
  0x42   :  { %582 = vmatmul.mubr.bf16.vlgmr.msra.gmra.mxu0 %v1005_v56  ;;  %940 = vmatprep.subr.bf16.mxu1 %v1033_v38 }
  0x45   :  { %941 = vmatpush3.bf16.msra.mxu1 %v1015_v63 }
  0x46   :  { %942 = vmatprep.subr.bf16.mxu1 %v1033_v38 }
  0x49   :  { %943 = vmatpush3.bf16.msra.mxu1 %v1016_v0 }
  0xe2   :  { %v861_v4 = vpop.f32.mrf.mxu0 }
  0xe4   :  { %v883_v1 = vpop.f32.mrf.mxu1  ;;  %v862_v7 = vpop.f32.mrf.mxu0 }
  0xe5   :  { %v863_v12 = vadd.f32 %v862_v7, %v861_v4 }
  0xe6   :  { %v884_v2 = vpop.f32.mrf.mxu1  ;;  %v864_v10 = vpop.f32.mrf.mxu0 }
  0xe7   :  { %v502_v15 = vadd.f32 %v863_v12, %v778_v13  ;;  %v885_v16 = vadd.f32 %v884_v2, %v883_v1 }
  0xe8   :  { %v886_v3 = vpop.f32.mrf.mxu1  ;;  %v865_v14 = vpop.f32.mrf.mxu0 }
  0xe9   :  { %v866_v17 = vadd.f32 %v865_v14, %v864_v10  ;;  %v543_v20 = vadd.f32 %v885_v16, %v502_v15 }
  0xea   :  { %v887_v5 = vpop.f32.mrf.mxu1 }
  0xeb   :  { %v505_v21 = vadd.f32 %v866_v17, %v778_v13  ;;  %v888_v22 = vadd.f32 %v887_v5, %v886_v3 }
  0xec   :  { %v624_v6 = vpop.f32.mrf.mxu1 }
  0xed   :  { %v546_v27 = vadd.f32 %v888_v22, %v505_v21 }
  0xee   :  { %v926_v8 = vpop.f32.mrf.mxu1 }
  0xf0   :  { %v627_v9 = vpop.f32.mrf.mxu1 }
  0xf2   :  { %v927_v11 = vpop.f32.mrf.mxu1 }
 0x102   :  { %v905_v18 = vpop.f32.mrf.mxu0 }
 0x104   :  { %v906_v19 = vpop.f32.mrf.mxu0 }
 0x105   :  { %v907_v23 = vadd.f32 %v906_v19, %v905_v18 }
 0x106   :  { %v908_v24 = vpop.f32.mrf.mxu0 }
 0x107   :  { %v584_v25 = vadd.f32 %v907_v23, %v543_v20 }
 0x108   :  { %v909_v26 = vpop.f32.mrf.mxu0 }
 0x109   :  { %v625_v28 = vadd.f32 %v624_v6, %v584_v25  ;;  %v910_v29 = vadd.f32 %v909_v26, %v908_v24 }
 0x10b   :  { %v631_v30 = vsub.f32 0.0, %v625_v28  ;;  %v587_v31 = vadd.f32 %v910_v29, %v546_v27 }
 0x10d   :  { %v633_v32 = vmul.f32 1.442695, %v631_v30  ;;  %v628_v33 = vadd.f32 %v627_v9, %v587_v31 }
 0x10f   :  { %1017 = vpow2.f32 %v633_v32  ;;  %v632_v34 = vsub.f32 0.0, %v628_v33 }
 0x111   :  { %v635_v35 = vmul.f32 1.442695, %v632_v34 }
 0x113   :  { %1019 = vpow2.f32 %v635_v35 }
 0x11c   :  { %v1018_v36 = vpop.eup %1017 }
 0x11d   :  { %v637_v37 = vadd.f32 1.0, %v1018_v36 }
 0x11f   :  { %1021 = vrcp.f32 %v637_v37 }
 0x120   :  { %v1020_v38 = vpop.eup %1019 }
 0x121   :  { %v638_v39 = vadd.f32 1.0, %v1020_v38 }
 0x123   :  { %1023 = vrcp.f32 %v638_v39 }
 0x12c   :  { %v1022_v40 = vpop.eup %1021 }
 0x130   :  { %v1024_v41 = vpop.eup %1023 }
 0x131   :  { %v641_v42 = vpack.c.bf16 %v1024_v41, %v1022_v40 }
 0x133   :  { %945 = vmatmul.mubr.bf16.vlgmr.msra.gmra.mxu1 %v641_v42 }
 0x1f3   :  { %v747_v44 = vpop.f32.mrf.mxu1 }
 0x1f4   :  { %v748_v45 = vadd.f32 %v836_v43, %v747_v44 }
 0x1f5   :  { %v946_v46 = vpop.f32.mrf.mxu1 }
 0x1f6   :  { %754 = vmax.xlane.f32.xlu0 %v748_v45 }
 0x1f7   :  { %v750_v47 = vpop.f32.mrf.mxu1 }
 0x1f8   :  { %v751_v48 = vadd.f32 %v836_v43, %v750_v47 }
 0x1f9   :  { %v947_v49 = vpop.f32.mrf.mxu1 }
 0x1fa   :  { %756 = vmax.xlane.f32.xlu0 %v751_v48 }
 0x27f   :  { %v755_v50 = vpop.xlane.xlu0 %754 }
 0x280   :  { %v758_v51 = vsub.f32 %v748_v45, %v755_v50 }
 0x282   :  { %v760_v52 = vmul.f32 1.442695, %v758_v51 }
 0x283   :  { %v757_v53 = vpop.xlane.xlu0 %756 }
 0x284   :  { %1025 = vpow2.f32 %v760_v52  ;;  %v759_v54 = vsub.f32 %v751_v48, %v757_v53 }
 0x286   :  { %v762_v55 = vmul.f32 1.442695, %v759_v54 }
 0x288   :  { %1027 = vpow2.f32 %v762_v55 }
 0x291   :  { %v1026_v56 = vpop.eup %1025 }
 0x292   :  { %764 = vadd.xlane.f32.xlu1 %v1026_v56 }
 0x295   :  { %v1028_v57 = vpop.eup %1027 }
 0x296   :  { %766 = vadd.xlane.f32.xlu1 %v1028_v57 }
 0x31b   :  { %v765_v58 = vpop.xlane.xlu1 %764 }
 0x31c   :  { %1029 = vrcp.f32 %v765_v58 }
 0x31f   :  { %v767_v59 = vpop.xlane.xlu1 %766 }
 0x320   :  { %1031 = vrcp.f32 %v767_v59 }
 0x329   :  { %v1030_v60 = vpop.eup %1029 }
 0x32a   :  { %v770_v61 = vmul.f32 %v1030_v60, %v1026_v56 }
 0x32c   :  { %772 = vst [vmem:[%s1287_s5] sm:$0xff] %v770_v61 }
 0x32d   :  { %v1032_v62 = vpop.eup %1031 }
 0x32e   :  { %v771_v63 = vmul.f32 %v1032_v62, %v1028_v57 }
 0x330   :  { %773 = vst [vmem:[%s1287_s5 + $0x8] sm:$0xff] %v771_v63 }

</bundles_post_ra>
